<compile_context>
chip_gen: v5e
topology: v5e:2x2
jax: 0.10.0
libtpu: 0.0.40
codegen_flags: <defaults>
</compile_context>

<pallas_src>
import functools

import jax
import jax.numpy as jnp
from jax.experimental import pallas as pl
from jax.experimental.pallas import tpu as pltpu

EPS = 1e-5
LANE = 128


def _round_up(x, m):
    return (x + m - 1) // m * m


def _pick_row_tile(r):
    """Largest row tile that divides r, is <= 512 and a multiple of 16 (8 as a
    fallback), preferring >= 2 grid steps so both v7x TensorCores get work."""
    upper = min(512, r if r < 32 else r // 2)
    for step in (16, 8):
        start = upper - upper % step
        for tr in range(start, step - 1, -step):
            if r % tr == 0:
                return tr
    return r


def _pick_batch_block(n, hw):
    """Images per 3x3 grid block: keep the matmul M dimension reasonably large
    (target ~512 rows) with bounded per-step VMEM, and prefer >= 2 grid steps
    (v7x megacore) when that does not shrink the block too much."""
    best = 1
    for b in range(1, n + 1):
        if n % b == 0 and b * hw <= max(512, hw):
            best = b
    if n // best < 2:
        for b in range(best - 1, 0, -1):
            if n % b == 0 and 2 * b * hw >= best * hw:
                best = b
                break
    return best


# --------------------------------------------------------------------------- #
# kernels
# --------------------------------------------------------------------------- #
def _rows_matmul_kernel(x_ref, w_ref, scale_ref, bias_ref,
                        out_ref, psum_ref, psumsq_ref, *, prologue):
    """[optional folded-BN+ReLU prologue] -> bf16 MXU matmul (f32 accumulate)
    -> bf16 activation store + f32 partial BN statistics."""
    tr, c = out_ref.shape
    if prologue:
        # BatchNorm folded into per-channel scale/bias (global batch stats) + ReLU.
        x = x_ref[...].astype(jnp.float32)
        x = jnp.maximum(x * scale_ref[...] + bias_ref[...], 0.0)
        x = x.astype(jnp.bfloat16)
    else:
        x = x_ref[...]                      # already bf16
    t = jnp.dot(x, w_ref[...], preferred_element_type=jnp.float32)
    out_ref[...] = t.astype(out_ref.dtype)  # bf16 inter-stage store
    # Single-pass partial statistics from the f32 accumulator, folded onto 8
    # sublane rows (the tiny (nt*8, C) -> (C,) reduction happens outside).
    psum_ref[...] = jnp.sum(t.reshape(tr // 8, 8, c), axis=0)
    psumsq_ref[...] = jnp.sum((t * t).reshape(tr // 8, 8, c), axis=0)


def _conv3x3_kernel(t_ref, w2_ref, scale_ref, bias_ref,
                    out_ref, psum_ref, psumsq_ref, pad_ref):
    """Folded BN+ReLU prologue -> 3x3 conv (9 accumulated K=C matmuls from a
    bf16 zero-bordered staging buffer) -> bf16 store + partial BN stats."""
    b, h, w, c = t_ref.shape
    hw = b * h * w

    # BN1 + ReLU prologue in f32, staged as bf16 into the padded interior.
    t = t_ref[...].astype(jnp.float32)
    t = jnp.maximum(t * scale_ref[...].reshape(1, 1, 1, c)
                    + bias_ref[...].reshape(1, 1, 1, c), 0.0)

    # Zero only the 1-pixel border strips.  NOTE: done every step (not just
    # program_id==0): with "parallel" semantics each TensorCore has its own
    # scratch, so a step-0-only zero would leave the second core's border
    # uninitialized.  The strips are ~2*(h+w) rows -> negligible store traffic.
    zrow = jnp.zeros((b, 1, w + 2, c), jnp.bfloat16)
    zcol = jnp.zeros((b, h + 2, 1, c), jnp.bfloat16)
    pad_ref[:, 0:1, :, :] = zrow
    pad_ref[:, h + 1:h + 2, :, :] = zrow
    pad_ref[:, :, 0:1, :] = zcol
    pad_ref[:, :, w + 1:w + 2, :] = zcol
    pad_ref[:, 1:1 + h, 1:1 + w, :] = t.astype(jnp.bfloat16)

    # 3x3 conv as 9 accumulated K=C matmuls from shifted bf16 views — no
    # im2col patch-matrix write (removes the sublane-misaligned re-layout
    # stores and halves the stage's VMEM footprint).
    acc = jnp.zeros((hw, c), jnp.float32)
    for kh in range(3):
        for kw in range(3):
            j = kh * 3 + kw
            tap = pad_ref[:, kh:kh + h, kw:kw + w, :].reshape(hw, c)
            acc = acc + jnp.dot(tap, w2_ref[j * c:(j + 1) * c, :],
                                preferred_element_type=jnp.float32)

    out_ref[...] = acc.reshape(b, h, w, c).astype(out_ref.dtype)   # bf16 store
    psum_ref[...] = jnp.sum(acc.reshape(hw // 8, 8, c), axis=0)
    psumsq_ref[...] = jnp.sum((acc * acc).reshape(hw // 8, 8, c), axis=0)


def _bn_add_relu_kernel(t_ref, idn_ref, scale_ref, bias_ref, out_ref):
    y = (t_ref[...].astype(jnp.float32) * scale_ref[...] + bias_ref[...]
         + idn_ref[...].astype(jnp.float32))
    out_ref[...] = jnp.maximum(y, 0.0)


# --------------------------------------------------------------------------- #
# pallas_call wrappers
# --------------------------------------------------------------------------- #
def _rows_call(x2d, w, scale, bias, *, prologue):
    r, cin = x2d.shape
    cout = w.shape[1]
    tr = _pick_row_tile(r)
    nt = r // tr
    kernel = functools.partial(_rows_matmul_kernel, prologue=prologue)
    return pl.pallas_call(
        kernel,
        grid=(nt,),
        in_specs=[
            pl.BlockSpec((tr, cin), lambda i: (i, 0)),
            pl.BlockSpec((cin, cout), lambda i: (0, 0)),
            pl.BlockSpec((1, cin), lambda i: (0, 0)),
            pl.BlockSpec((1, cin), lambda i: (0, 0)),
        ],
        out_specs=(
            pl.BlockSpec((tr, cout), lambda i: (i, 0)),
            pl.BlockSpec((8, cout), lambda i: (i, 0)),
            pl.BlockSpec((8, cout), lambda i: (i, 0)),
        ),
        out_shape=(
            jax.ShapeDtypeStruct((r, cout), jnp.bfloat16),      # bf16 activations
            jax.ShapeDtypeStruct((nt * 8, cout), jnp.float32),  # partial sum
            jax.ShapeDtypeStruct((nt * 8, cout), jnp.float32),  # partial sum-of-sq
        ),
        compiler_params=pltpu.CompilerParams(
            dimension_semantics=("parallel",)),
    )(x2d, w, scale, bias)


def _conv3x3_call(t_nhwc, w2_flat, scale, bias):
    n, h, w, c = t_nhwc.shape
    bb = _pick_batch_block(n, h * w)
    nb = n // bb
    assert (bb * h * w) % 8 == 0, "3x3 block rows must be a multiple of 8"
    return pl.pallas_call(
        _conv3x3_kernel,
        grid=(nb,),
        in_specs=[
            pl.BlockSpec((bb, h, w, c), lambda i: (i, 0, 0, 0)),
            pl.BlockSpec((9 * c, c), lambda i: (0, 0)),
            pl.BlockSpec((1, c), lambda i: (0, 0)),
            pl.BlockSpec((1, c), lambda i: (0, 0)),
        ],
        out_specs=(
            pl.BlockSpec((bb, h, w, c), lambda i: (i, 0, 0, 0)),
            pl.BlockSpec((8, c), lambda i: (i, 0)),
            pl.BlockSpec((8, c), lambda i: (i, 0)),
        ),
        out_shape=(
            jax.ShapeDtypeStruct((n, h, w, c), jnp.bfloat16),
            jax.ShapeDtypeStruct((nb * 8, c), jnp.float32),
            jax.ShapeDtypeStruct((nb * 8, c), jnp.float32),
        ),
        scratch_shapes=[
            pltpu.VMEM((bb, h + 2, w + 2, c), jnp.bfloat16),   # zero-bordered staging
        ],
        compiler_params=pltpu.CompilerParams(
            dimension_semantics=("parallel",),
            vmem_limit_bytes=64 * 1024 * 1024),
    )(t_nhwc, w2_flat, scale, bias)


def _bn_add_relu_call(t3, idn, scale, bias):
    r, c = t3.shape
    tr = _pick_row_tile(r)
    nt = r // tr
    return pl.pallas_call(
        _bn_add_relu_kernel,
        grid=(nt,),
        in_specs=[
            pl.BlockSpec((tr, c), lambda i: (i, 0)),
            pl.BlockSpec((tr, c), lambda i: (i, 0)),
            pl.BlockSpec((1, c), lambda i: (0, 0)),
            pl.BlockSpec((1, c), lambda i: (0, 0)),
        ],
        out_specs=pl.BlockSpec((tr, c), lambda i: (i, 0)),
        out_shape=jax.ShapeDtypeStruct((r, c), jnp.float32),    # block output
        compiler_params=pltpu.CompilerParams(
            dimension_semantics=("parallel",)),
    )(t3, idn, scale, bias)


def _finalize_bn(psum, psumsq, count, gamma, beta):
    # Tiny (num_tiles*8, C) -> (C,) reduction + fold into scale/bias, in f32.
    # TODO(synk): E[x^2]-E[x]^2 can cancel for |mean| >> std; switch to a
    # shifted/Welford accumulation for trained networks.
    s = jnp.sum(psum, axis=0)
    ss = jnp.sum(psumsq, axis=0)
    mean = s / count
    var = jnp.maximum(ss / count - mean * mean, 0.0)
    inv = jax.lax.rsqrt(var + EPS)
    scale = gamma.reshape(-1) * inv
    bias = beta.reshape(-1) - mean * scale
    return scale.reshape(1, -1), bias.reshape(1, -1)


# --------------------------------------------------------------------------- #
# forward pass
# --------------------------------------------------------------------------- #
def bottleneck_forward_nhwc(x_nhwc, params):
    n, h, w, cin = x_nhwc.shape
    planes = params["w1"].shape[1]
    cout = params["w3"].shape[1]
    assert cout == cin, "stride=1, downsample=None => identity add needs Cin == 4*planes"
    r = n * h * w
    assert r % 8 == 0, "N*H*W must be a multiple of 8"

    # Lane-dense channel padding (multiples of 128).  Pad channels carry exact
    # zeros end-to-end (zero weight rows/cols, gamma = beta = 0).
    cin_p = _round_up(cin, LANE)
    p_p = _round_up(planes, LANE)
    c4_p = _round_up(cout, LANE)

    def pad2(a, rr, cc):
        return jnp.pad(a, ((0, rr - a.shape[0]), (0, cc - a.shape[1])))

    # (In a full network the padded bf16 weights would be prepared once.)
    w1 = pad2(params["w1"], cin_p, p_p).astype(jnp.bfloat16)
    w3 = pad2(params["w3"], p_p, c4_p).astype(jnp.bfloat16)
    w2 = jnp.pad(params["w2"], ((0, 0), (0, 0), (0, p_p - planes), (0, p_p - planes)))
    w2 = w2.reshape(9 * p_p, p_p).astype(jnp.bfloat16)       # row = (kh*3+kw)*C + cin
    g1 = pad2(params["g1"], 1, p_p); b1 = pad2(params["b1"], 1, p_p)
    g2 = pad2(params["g2"], 1, p_p); b2 = pad2(params["b2"], 1, p_p)
    g3 = pad2(params["g3"], 1, c4_p); b3 = pad2(params["b3"], 1, c4_p)

    # Identity / conv1 input stored once, lane-dense, bf16 (halved HBM traffic).
    x2d = jnp.pad(x_nhwc.astype(jnp.float32),
                  ((0, 0), (0, 0), (0, 0), (0, cin_p - cin)))
    x2d = x2d.reshape(r, cin_p).astype(jnp.bfloat16)
    ones = jnp.ones((1, cin_p), jnp.float32)
    zeros = jnp.zeros((1, cin_p), jnp.float32)

    # conv1 (1x1) + partial BN1 stats
    t1, s1, ss1 = _rows_call(x2d, w1, ones, zeros, prologue=False)
    scale1, bias1 = _finalize_bn(s1, ss1, r, g1, b1)

    # BN1+ReLU fused prologue -> conv2 (3x3) + BN2 stats
    t2, s2, ss2 = _conv3x3_call(t1.reshape(n, h, w, p_p), w2, scale1, bias1)
    scale2, bias2 = _finalize_bn(s2, ss2, r, g2, b2)

    # BN2+ReLU fused prologue -> conv3 (1x1, expansion 4) + BN3 stats
    t3, s3, ss3 = _rows_call(t2.reshape(r, p_p), w3, scale2, bias2, prologue=True)
    scale3, bias3 = _finalize_bn(s3, ss3, r, g3, b3)

    # BN3 + residual add + ReLU  (in a full network: fuse into next conv1 prologue)
    y2d = _bn_add_relu_call(t3, x2d, scale3, bias3)
    return y2d.reshape(n, h, w, c4_p)[:, :, :, :cout]


def bottleneck_forward(x_nchw, params):
    # NCHW boundary for PyTorch parity; in a full network keep activations NHWC
    # end-to-end and call bottleneck_forward_nhwc directly (transpose once).
    x = jnp.transpose(x_nchw, (0, 2, 3, 1))
    y = bottleneck_forward_nhwc(x, params)
    return jnp.transpose(y, (0, 3, 1, 2))


# --------------------------------------------------------------------------- #
# pure-JAX reference (bf16 matmul operands, f32 intermediates)
# --------------------------------------------------------------------------- #
def bottleneck_reference(x_nchw, params):
    x = jnp.transpose(x_nchw, (0, 2, 3, 1)).astype(jnp.float32)

    def bn(t, g, b):
        m = jnp.mean(t, axis=(0, 1, 2), keepdims=True)
        v = jnp.mean((t - m) ** 2, axis=(0, 1, 2), keepdims=True)
        return (t - m) * jax.lax.rsqrt(v + EPS) * g.reshape(1, 1, 1, -1) + b.reshape(1, 1, 1, -1)

    def mm(a, wmat):
        return jnp.einsum("nhwc,cd->nhwd", a.astype(jnp.bfloat16),
                          wmat.astype(jnp.bfloat16),
                          preferred_element_type=jnp.float32)

    t = mm(x, params["w1"])
    t = jax.nn.relu(bn(t, params["g1"], params["b1"]))
    t = jax.lax.conv_general_dilated(
        t.astype(jnp.bfloat16), params["w2"].astype(jnp.bfloat16),
        window_strides=(1, 1), padding="SAME",
        dimension_numbers=("NHWC", "HWIO", "NHWC"),
        preferred_element_type=jnp.float32)
    t = jax.nn.relu(bn(t, params["g2"], params["b2"]))
    t = mm(t, params["w3"])
    t = bn(t, params["g3"], params["b3"])
    y = jax.nn.relu(t + x)
    return jnp.transpose(y, (0, 3, 1, 2))


def make_params(key, inplanes, planes):
    expansion = 4
    ks = jax.random.split(key, 9)
    return {
        "w1": 0.1 * jax.random.normal(ks[0], (inplanes, planes), jnp.float32),
        "g1": 1.0 + 0.1 * jax.random.normal(ks[1], (1, planes), jnp.float32),
        "b1": 0.1 * jax.random.normal(ks[2], (1, planes), jnp.float32),
        "w2": 0.1 * jax.random.normal(ks[3], (3, 3, planes, planes), jnp.float32),
        "g2": 1.0 + 0.1 * jax.random.normal(ks[4], (1, planes), jnp.float32),
        "b2": 0.1 * jax.random.normal(ks[5], (1, planes), jnp.float32),
        "w3": 0.1 * jax.random.normal(ks[6], (planes, planes * expansion), jnp.float32),
        "g3": 1.0 + 0.1 * jax.random.normal(ks[7], (1, planes * expansion), jnp.float32),
        "b3": 0.1 * jax.random.normal(ks[8], (1, planes * expansion), jnp.float32),
    }


if __name__ == "__main__":
    # Bottleneck(inplanes=16, planes=4, stride=1, downsample=None)
    N, inplanes, planes, H, W = 2, 16, 4, 8, 8

    key = jax.random.PRNGKey(0)
    kx, kp = jax.random.split(key)
    x = jax.random.normal(kx, (N, inplanes, H, W), jnp.float32)   # NCHW like PyTorch
    params = make_params(kp, inplanes, planes)

    out = jax.block_until_ready(bottleneck_forward(x, params))
    ref = jax.block_until_ready(bottleneck_reference(x, params))

    assert out.shape == (N, inplanes, H, W)
    err = float(jnp.max(jnp.abs(out - ref)))
    # Loose tolerance: bf16 matmul operands AND bf16 inter-stage activations
    # (intentional bandwidth optimization) vs. an f32-intermediate reference.
    assert jnp.allclose(out, ref, rtol=1e-1, atol=1e-1), f"max abs err {err}"

    print("KERNEL_OK")
</pallas_src>

<mosaic_0001>
module attributes {stable_mosaic.version = 11 : i64} {
  func.func @_rows_matmul_kernel(%arg0: i32, %arg1: memref<64x128xbf16, #tpu.memory_space<vmem>>, %arg2: memref<128x128xbf16, #tpu.memory_space<vmem>>, %arg3: memref<1x128xf32, #tpu.memory_space<vmem>>, %arg4: memref<1x128xf32, #tpu.memory_space<vmem>>, %arg5: memref<64x128xbf16, #tpu.memory_space<vmem>>, %arg6: memref<8x128xf32, #tpu.memory_space<vmem>>, %arg7: memref<8x128xf32, #tpu.memory_space<vmem>>) attributes {dimension_semantics = [#tpu.dimension_semantics<parallel>], iteration_bounds = array<i64: 2>, scalar_prefetch = 0 : i64, scratch_operands = 0 : i64, tpu.core_type = #tpu.core_type<tc>, window_params = [{transform_indices = @transform_0, window_bounds = array<i64: 64, 128>}, {pipeline_mode = #tpu.pipeline_mode<synchronous>, transform_indices = @transform_1, window_bounds = array<i64: 128, 128>}, {pipeline_mode = #tpu.pipeline_mode<synchronous>, transform_indices = @transform_2, window_bounds = array<i64: 1, 128>}, {pipeline_mode = #tpu.pipeline_mode<synchronous>, transform_indices = @transform_3, window_bounds = array<i64: 1, 128>}, {transform_indices = @transform_4, window_bounds = array<i64: 64, 128>}, {transform_indices = @transform_5, window_bounds = array<i64: 8, 128>}, {transform_indices = @transform_6, window_bounds = array<i64: 8, 128>}]} {
    %c0 = arith.constant 0 : index
    %c0_0 = arith.constant 0 : index
    %0 = vector.load %arg1[%c0, %c0_0] : memref<64x128xbf16, #tpu.memory_space<vmem>>, vector<64x128xbf16>
    %c0_1 = arith.constant 0 : index
    %c0_2 = arith.constant 0 : index
    %1 = vector.load %arg2[%c0_1, %c0_2] : memref<128x128xbf16, #tpu.memory_space<vmem>>, vector<128x128xbf16>
    %cst = arith.constant dense<0.000000e+00> : vector<64x128xf32>
    %2 = tpu.matmul %0, %1, %cst {dimension_numbers = #tpu.dot_dimension_numbers<[1], [0], [0], [1], [0, 0, 1, 1], [], []>} : vector<64x128xbf16>, vector<128x128xbf16>, vector<64x128xf32> -> vector<64x128xf32>
    %3 = arith.truncf %2 : vector<64x128xf32> to vector<64x128xbf16>
    %c0_3 = arith.constant 0 : index
    %c0_4 = arith.constant 0 : index
    %4 = vector.load %arg5[%c0_3, %c0_4] : memref<64x128xbf16, #tpu.memory_space<vmem>>, vector<64x128xbf16>
    tpu.vector_store %arg5[%c0_3, %c0_4], %3 {strides = array<i32>} : memref<64x128xbf16, #tpu.memory_space<vmem>>, vector<64x128xbf16>,
    %5 = vector.shape_cast %2 : vector<64x128xf32> to vector<8x8x128xf32>
    %cst_5 = arith.constant dense<0.000000e+00> : vector<8x128xf32>
    %6 = vector.multi_reduction <add>, %5, %cst_5 [0] : vector<8x8x128xf32> to vector<8x128xf32>
    %c0_6 = arith.constant 0 : index
    %c0_7 = arith.constant 0 : index
    %7 = vector.load %arg6[%c0_6, %c0_7] : memref<8x128xf32, #tpu.memory_space<vmem>>, vector<8x128xf32>
    tpu.vector_store %arg6[%c0_6, %c0_7], %6 {strides = array<i32>} : memref<8x128xf32, #tpu.memory_space<vmem>>, vector<8x128xf32>,
    %8 = arith.mulf %2, %2 : vector<64x128xf32>
    %9 = vector.shape_cast %8 : vector<64x128xf32> to vector<8x8x128xf32>
    %cst_8 = arith.constant dense<0.000000e+00> : vector<8x128xf32>
    %10 = vector.multi_reduction <add>, %9, %cst_8 [0] : vector<8x8x128xf32> to vector<8x128xf32>
    %c0_9 = arith.constant 0 : index
    %c0_10 = arith.constant 0 : index
    %11 = vector.load %arg7[%c0_9, %c0_10] : memref<8x128xf32, #tpu.memory_space<vmem>>, vector<8x128xf32>
    tpu.vector_store %arg7[%c0_9, %c0_10], %10 {strides = array<i32>} : memref<8x128xf32, #tpu.memory_space<vmem>>, vector<8x128xf32>,
    return
  }
  func.func @transform_0(%arg0: i32) -> (i32, i32) {
    %c0_i32 = arith.constant 0 : i32
    %c0_i32_0 = arith.constant 0 : i32
    return %arg0, %c0_i32 : i32, i32
  }
  func.func @transform_1(%arg0: i32) -> (i32, i32) {
    %c0_i32 = arith.constant 0 : i32
    %c0_i32_0 = arith.constant 0 : i32
    %c0_i32_1 = arith.constant 0 : i32
    return %c0_i32, %c0_i32_0 : i32, i32
  }
  func.func @transform_2(%arg0: i32) -> (i32, i32) {
    %c0_i32 = arith.constant 0 : i32
    %c0_i32_0 = arith.constant 0 : i32
    %c0_i32_1 = arith.constant 0 : i32
    return %c0_i32, %c0_i32_0 : i32, i32
  }
  func.func @transform_3(%arg0: i32) -> (i32, i32) {
    %c0_i32 = arith.constant 0 : i32
    %c0_i32_0 = arith.constant 0 : i32
    %c0_i32_1 = arith.constant 0 : i32
    return %c0_i32, %c0_i32_0 : i32, i32
  }
  func.func @transform_4(%arg0: i32) -> (i32, i32) {
    %c0_i32 = arith.constant 0 : i32
    %c0_i32_0 = arith.constant 0 : i32
    return %arg0, %c0_i32 : i32, i32
  }
  func.func @transform_5(%arg0: i32) -> (i32, i32) {
    %c0_i32 = arith.constant 0 : i32
    %c0_i32_0 = arith.constant 0 : i32
    return %arg0, %c0_i32 : i32, i32
  }
  func.func @transform_6(%arg0: i32) -> (i32, i32) {
    %c0_i32 = arith.constant 0 : i32
    %c0_i32_0 = arith.constant 0 : i32
    return %arg0, %c0_i32 : i32, i32
  }
}

</mosaic_0001>

<bundles_post_ra>
// kernel: tpu_custom_call.1
= control target key start
LH: loop header
LB: loop body
LE: loop exit
PB: predicated region body
PF: predicated region fallthrough
CT: control target
= control target key end

     0   :  { %s1338_s0 = inlined_call_operand.hbm [shape: bf16[128,128], index: 0, kind: input, shape index: {}]   ;;  %s1339_s1 = inlined_call_operand.hbm [shape: bf16[128,128], index: 1, kind: input, shape index: {}]   ;;  %s1340_s2 = inlined_call_operand.vmem [shape: f32[1,128], index: 2, kind: input, shape index: {}]   ;;  %s1341_s3 = inlined_call_operand.vmem [shape: f32[1,128], index: 3, kind: input, shape index: {}]   ;;  %s1342_s4 = inlined_call_operand.hbm [shape: bf16[128,128], index: 4, kind: output, shape index: {0}]   ;;  %s1343_s5 = inlined_call_operand.hbm [shape: f32[16,128], index: 5, kind: output, shape index: {1}]   ;;  %s1344_s6 = inlined_call_operand.hbm [shape: f32[16,128], index: 6, kind: output, shape index: {2}]  }
   0x1   :  { %1346 = sst [smem:[#allocation15_spill]] %s1338_s0 }
   0x2   :  { %12 = vsyncpa [#allocation3], 0 }
   0x3   :  { %14 = vsyncpa [#allocation3 + $0x1], 0 }
   0x4   :  { %15 = vsyncpa [#allocation6], 0 }
   0x5   :  { %16 = vsyncpa [#allocation4], 0 }
   0x6   :  { %18 = vsyncpa [#allocation4 + $0x1], 0 }
   0x7   :  { %19 = vsyncpa [#allocation9], 0 }
   0x8   :  { %21 = vsyncpa [#allocation9 + $0x1], 0  ;;  %s1108_s2 = smov 0   ;;  %s1110_s21 = smov 0  }
   0x9   :  { %s1112_s3 = smov 0   ;;  %s1114_s22 = smov 0  }
   0xa LB: > { %s1129_s23 = sadd.s32 4294967295, %s1066_s22   ;;  %s1345_s24 = sadd.s32 4294967294, %s1066_s22   ;;  %s1066_s22 = sphi %s1114_s22, %s1360_s22   ;;  %s1062_s3 = sphi %s1112_s3, %s1359_s3   ;;  %s1058_s21 = sphi %s1110_s21, %s1358_s21   ;;  %s1054_s2 = sphi %s1108_s2, %s1357_s2  }
   0xb   : > { %p47_p0 = scmp.ne.s32.totalorder %s1058_s21, %s1054_s2  ;;  %p48_p1 = scmp.eq.s32.totalorder %s1129_s23, 0 }
   0xc   : > { %p134_p2 = scmp.eq.s32.totalorder %s1129_s23, 1  ;;  %p140_p3 = scmp.eq.s32.totalorder %s1345_s24, 1 }
   0xd   : > { %p1140_p4 = por %p48_p1, %p47_p0  ;;  %p675_p5 = scmp.ge.s32.totalorder %s1066_s22, 1 }
   0xe   : > { %p1145_p6 = por %p140_p3, %p47_p0  ;;  %p199_p7 = scmp.lt.s32.totalorder %s1066_s22, 3 }
   0xf   : > { %s210_s29 = sshll.u32 %s1339_s1, 4  ;;  %s1068_s7 = smov [#allocation5]   ;;  %s211_s29 = int_to_ptr.hbm [resolvable:$true] %s210_s29 }
  0x10   : > { %p1153_p8 = pnand %p675_p5, %p199_p7  ;;  %s212_s8 = sshll.u32 %s1068_s7, 4  ;;  %s213_s8 = int_to_ptr.vmem [resolvable:$true] %s212_s8 }
  0x11   : > { %s1163_s9 = sadd.s32 1, %s1066_s22   ;;  %s1069_s10 = smov 64  }
  0x12   : > { %p817_p9 = pneg %p1153_p8  ;;  %s1070_s11 = smov 4  }
  0x13   : > { %s31_s12 = ssub.s32 %s1066_s22, %s1163_s9  ;;  %s34_s13 = sadd.s32 1, %s1062_s3 }
  0x14   : > { %p818_p10 = pnand %p817_p9, %p48_p1  ;;  %p32_p12 = scmp.eq.s32.totalorder %s31_s12, 0 }
  0x15   : > { %p41_p13 = scmp.ne.s32.totalorder %s1062_s3, %s1058_s21  ;;  %p42_p0 = scmp.eq.s32.totalorder %s1066_s22, 0 }
  0x16   : > { %820 = dma.hbm_to_vmem [thread:$0]  (!%p818_p10), %s211_s29, 1024, %s213_s8, [#allocation6], %s1069_s10, %s1069_s10, %s1070_s11  }
  0x17   : > { %s1175_s14 = scalar_select %p32_p12, %s1062_s3, %s34_s13  }
  0x18   : > { %p1179_p3 = por %p134_p2, %p41_p13  ;;  %p836_p5 = scmp.lt.s32.totalorder %s1066_s22, 2 }
  0x19   : > { %s232_s16 = sand.u32 1, %s1062_s3   ;;  %s744_s17 = sshll.u32 %s1066_s22, 5 }
  0x1a   : > { %p43_p7 = por %p42_p0, %p41_p13  ;;  %s678_s18 = sshll.u32 %s232_s16, 5 }
  0x1b   : > { %s1351_s0 = sld [smem:[#allocation15_spill]]  ;;  %s236_s29 = scalar_lea.vmem [#allocation2], %s678_s18 }
  0x1c   : > { %s244_s7 = sshll.u32 %s236_s29, 4  ;;  %p1189_p9 = pnand %p836_p5, %p43_p7  ;;  %s245_s7 = int_to_ptr.vmem [resolvable:$true] %s244_s7 }
  0x1d   : > { %s233_s12 = scalar_lea.sflag [#allocation3], %s232_s16 }
  0x1e   : > { %p910_p10 = pneg %p1189_p9 }
  0x21   : > { %s241_s27 = scalar_lea.hbm %s1351_s0, %s744_s17  ;;  %s913_s18 = scalar_lea.hbm %s1351_s0, 64 }
  0x22   : > { %s242_s28 = sshll.u32 %s241_s27, 4  ;;  %s243_s28 = int_to_ptr.hbm [resolvable:$true] %s242_s28 }
  0x23   : > { %s906_s13 = sshra.s32 %s243_s28, 4  ;;  %s907_s13 = int_to_ptr.hbm [resolvable:$true] %s906_s13 }
  0x24   : > { %s908_s24 = scalar_lea.hbm %s907_s13, 32  ;;  %p914_p0 = scmp.lt.s32.totalorder %s907_s13, %s1351_s0 }
  0x25   : > { %p909_p2 = scmp.ne.s32.totalorder %s907_s13, %s908_s24  ;;  %p915_p5 = scmp.lt.s32.totalorder %s913_s18, %s908_s24 }
  0x27   : > { %p911_p12 = pnand %p910_p10, %p909_p2  ;;  %p916_p7 = por %p915_p5, %p914_p0 }
  0x29   : > { %p912_p13 = pneg %p911_p12 }
  0x2b   : > { %p917_p11 = pnand %p916_p7, %p912_p13 }
  0x2d   : > { %920 = shalt.err (!%p917_p11)
}
  0x2e   : > { %824 = dma.hbm_to_vmem [thread:$0]  (!%p1189_p9), %s243_s28, 512, %s245_s7, %s233_s12, %s1069_s10, %s1069_s10, %s1070_s11  }
  0x2f   : > { %256 = sbr.rel (%p1153_p8) target bundleno = 260 (0x104), region = 36  ;;  %s1209_s16 = sand.u32 (!%p1153_p8), 1, %s1058_s21  }
  0x30   : > { %s682_s24 = sshll.u32 (!%p1153_p8), %s1209_s16, 5  ;;  %s259_s29 = scalar_lea.sflag (!%p1153_p8), [#allocation3], %s1209_s16 }
  0x31   : > { %s1215_s13 = scalar_lea.vmem (!%p1153_p8), [#allocation2], %s682_s24 }
  0x34   : > { %1037 = dma.done.wait (%p1140_p4), %s259_s29, 512  }
  0x35   : > { %1039 = vsyncadd (%p1140_p4), %s259_s29, 4294966784 }
  0x36   : > { %1041 = dma.done.wait (%p48_p1), [#allocation6], 1024  }
  0x37   : > { %1043 = vsyncadd (%p48_p1), [#allocation6], 4294966272  ;;  %v756_v0 = vld [vmem:[#allocation5 + $0x38] sm:$0xff]  ;;  %v755_v1 = vld [vmem:[#allocation5 + $0x30] sm:$0xff]  ;;  %s757_s25 = sshll.u32 %s1129_s23, 5  ;;  %s1232_s30 = scalar_lea.vmem [#allocation7], %s682_s24 }
  0x38   : > { %405 = vmatpush.bf16.msra.mxu0 %v756_v0  ;;  %781 = vmatpush.bf16.msra.mxu1 %v756_v0  ;;  %v754_v2 = vld [vmem:[#allocation5 + $0x28] sm:$0xff]  ;;  %v753_v3 = vld [vmem:[#allocation5 + $0x20] sm:$0xff]  ;;  %v752_v4 = vld [vmem:[#allocation5 + $0x18] sm:$0xff]  ;;  %s497_s10 = sshll.u32 %s1232_s30, 4  ;;  %s685_s11 = sshll.u32 %s1209_s16, 3  ;;  %s1241_s10 = int_to_ptr.vmem [resolvable:$true] %s497_s10 }
  0x39   : > { %782 = vmatpush.bf16.msra.mxu2 %v756_v0  ;;  %783 = vmatpush.bf16.msra.mxu3 %v756_v0  ;;  %v751_v5 = vld [vmem:[#allocation5 + $0x10] sm:$0xff]  ;;  %v750_v6 = vld [vmem:[#allocation5 + $0x8] sm:$0xff]  ;;  %v749_v7 = vld [vmem:[#allocation5] sm:$0xff]  ;;  %s496_s12 = scalar_lea.hbm %s1342_s4, %s757_s25  ;;  %s740_s17 = sshll.u32 %s1129_s23, 3 }
  0x3a   : > { %v745_v8 = vld [vmem:[%s1215_s13] sm:$0xff]  ;;  %v746_v9 = vld [vmem:[%s1215_s13 + $0x8] sm:$0xff]  ;;  %v747_v10 = vld [vmem:[%s1215_s13 + $0x10] sm:$0xff]  ;;  %s499_s19 = sshll.u32 %s496_s12, 4  ;;  %s1248_s27 = scalar_lea.hbm %s1343_s5, %s740_s17  ;;  %s1255_s19 = int_to_ptr.hbm [resolvable:$true] %s499_s19 }
  0x3b   : > { %v748_v11 = vld [vmem:[%s1215_s13 + $0x18] sm:$0xff]  ;;  %s1253_s13 = scalar_lea.hbm %s1344_s6, %s740_s17  ;;  %s1260_s25 = scalar_lea.vmem [#allocation8], %s685_s11 }
  0x3c   : > { %406 = vmatpush.bf16.msra.mxu0 %v755_v1  ;;  %784 = vmatpush.bf16.msra.mxu1 %v755_v1  ;;  %s516_s8 = sshll.u32 %s1248_s27, 4  ;;  %s530_s12 = sshll.u32 %s1253_s13, 4  ;;  %s517_s8 = int_to_ptr.hbm [resolvable:$true] %s516_s8  ;;  %s1290_s12 = int_to_ptr.hbm [resolvable:$true] %s530_s12 }
  0x3d   : > { %785 = vmatpush.bf16.msra.mxu2 %v755_v1  ;;  %786 = vmatpush.bf16.msra.mxu3 %v755_v1  ;;  %s1268_s17 = scalar_lea.vmem [#allocation10], %s685_s11  ;;  %s475_s20 = scalar_lea.sflag [#allocation4], %s1209_s16 }
  0x3e   : > { %s528_s18 = sshll.u32 %s1268_s17, 4  ;;  %s950_s24 = sshra.s32 %s1255_s19, 4  ;;  %s951_s24 = int_to_ptr.hbm [resolvable:$true] %s950_s24  ;;  %s1288_s18 = int_to_ptr.vmem [resolvable:$true] %s528_s18 }
  0x3f   : > { %s952_s29 = scalar_lea.hbm %s951_s24, 32  ;;  %s956_s7 = scalar_lea.hbm %s1342_s4, 64 }
  0x40   : > { %407 = vmatpush.bf16.msra.mxu0 %v754_v2  ;;  %787 = vmatpush.bf16.msra.mxu1 %v754_v2  ;;  %p953_p1 = scmp.ne.s32.totalorder %s951_s24, %s952_s29  ;;  %p957_p11 = scmp.lt.s32.totalorder %s951_s24, %s1342_s4 }
  0x41   : > { %788 = vmatpush.bf16.msra.mxu2 %v754_v2  ;;  %789 = vmatpush.bf16.msra.mxu3 %v754_v2  ;;  %p958_p9 = scmp.lt.s32.totalorder %s956_s7, %s952_s29 }
  0x42   : > { %p954_p4 = pnand %p953_p1, %p1179_p3 }
  0x43   : > { %p959_p2 = por %p958_p9, %p957_p11 }
  0x44   : > { %408 = vmatpush.bf16.msra.mxu0 %v753_v3  ;;  %790 = vmatpush.bf16.msra.mxu1 %v753_v3  ;;  %p955_p8 = pneg %p954_p4 }
  0x45   : > { %791 = vmatpush.bf16.msra.mxu2 %v753_v3  ;;  %792 = vmatpush.bf16.msra.mxu3 %v753_v3 }
  0x46   : > { %p960_p10 = pnand %p959_p2, %p955_p8 }
  0x48   : > { %409 = vmatpush.bf16.msra.mxu0 %v752_v4  ;;  %793 = vmatpush.bf16.msra.mxu1 %v752_v4 }
  0x49   : > { %794 = vmatpush.bf16.msra.mxu2 %v752_v4  ;;  %795 = vmatpush.bf16.msra.mxu3 %v752_v4 }
  0x4c   : > { %410 = vmatpush.bf16.msra.mxu0 %v751_v5  ;;  %796 = vmatpush.bf16.msra.mxu1 %v751_v5 }
  0x4d   : > { %797 = vmatpush.bf16.msra.mxu2 %v751_v5  ;;  %798 = vmatpush.bf16.msra.mxu3 %v751_v5 }
  0x50   : > { %411 = vmatpush.bf16.msra.mxu0 %v750_v6  ;;  %799 = vmatpush.bf16.msra.mxu1 %v750_v6 }
  0x51   : > { %800 = vmatpush.bf16.msra.mxu2 %v750_v6  ;;  %801 = vmatpush.bf16.msra.mxu3 %v750_v6 }
  0x54   : > { %412 = vmatpush.bf16.msra.mxu0 %v749_v7  ;;  %802 = vmatpush.bf16.msra.mxu1 %v749_v7 }
  0x55   : > { %803 = vmatpush.bf16.msra.mxu2 %v749_v7  ;;  %804 = vmatpush.bf16.msra.mxu3 %v749_v7 }
  0x57   : > { %413 = vmatmul.bf16.vlgmr.msra.gmra.mxu0 %v745_v8  ;;  %418 = vmatmul.bf16.vlgmr.msra.gmra.mxu1 %v746_v9 }
  0x58   : > { %423 = vmatmul.bf16.vlgmr.msra.gmra.mxu2 %v747_v10  ;;  %428 = vmatmul.bf16.vlgmr.msra.gmra.mxu3 %v748_v11 }
  0xd4   : > { %v414_v12 = vpop.f32.mrf.mxu0  ;;  %v419_v13 = vpop.f32.mrf.mxu1 }
  0xd5   : > { %v458_v16 = vmul.f32 %v414_v12, %v414_v12  ;;  %v460_v23 = vmul.f32 %v419_v13, %v419_v13 }
  0xdb   : > { %v424_v14 = vpop.f32.mrf.mxu2  ;;  %v429_v15 = vpop.f32.mrf.mxu3 }
  0xdc   : > { %v416_v17 = vpop.f32.mrf.mxu0  ;;  %v421_v18 = vpop.f32.mrf.mxu1  ;;  %v462_v29 = vmul.f32 %v424_v14, %v424_v14  ;;  %v464_v39 = vmul.f32 %v429_v15, %v429_v15 }
  0xdd   : > { %v761_v19 = vpack.c.bf16 %v416_v17, %v414_v12  ;;  %v450_v20 = vadd.f32 %v416_v17, %v414_v12  ;;  %v459_v21 = vmul.f32 %v416_v17, %v416_v17  ;;  %v766_v22 = vpack.c.bf16 %v421_v18, %v419_v13 }
  0xde   : > { %v461_v27 = vmul.f32 %v421_v18, %v421_v18 }
  0xdf   : > { %762 = vst [vmem:[%s1232_s30] sm:$0xff] %v761_v19   ;;  %v466_v24 = vadd.f32 %v459_v21, %v458_v16  ;;  %v451_v25 = vadd.f32 %v450_v20, %v419_v13 }
  0xe0   : > { %778 = vst [vmem:[%s1232_s30 + $0x8] sm:$0xff] %v766_v22  }
  0xe1   : > { %v452_v26 = vadd.f32 %v451_v25, %v421_v18  ;;  %v467_v28 = vadd.f32 %v466_v24, %v460_v23 }
  0xe3   : > { %v468_v30 = vadd.f32 %v467_v28, %v461_v27  ;;  %v426_v31 = vpop.f32.mrf.mxu2  ;;  %v453_v32 = vadd.f32 %v452_v26, %v424_v14  ;;  %v431_v33 = vpop.f32.mrf.mxu3 }
  0xe4   : > { %v771_v34 = vpack.c.bf16 %v426_v31, %v424_v14  ;;  %v776_v35 = vpack.c.bf16 %v431_v33, %v429_v15  ;;  %v463_v37 = vmul.f32 %v426_v31, %v426_v31 }
  0xe5   : > { %v454_v36 = vadd.f32 %v453_v32, %v426_v31  ;;  %v469_v38 = vadd.f32 %v468_v30, %v462_v29 }
  0xe6   : > { %779 = vst [vmem:[%s1232_s30 + $0x10] sm:$0xff] %v771_v34  }
  0xe7   : > { %v470_v40 = vadd.f32 %v469_v38, %v463_v37  ;;  %780 = vst [vmem:[%s1232_s30 + $0x18] sm:$0xff] %v776_v35   ;;  %v455_v41 = vadd.f32 %v454_v36, %v429_v15 }
  0xe8   : > { %963 = shalt.err (!%p960_p10)
}
  0xe9   : > { %s1071_s16 = smov 64   ;;  %s1072_s11 = smov 4   ;;  %v456_v42 = vadd.f32 %v455_v41, %v431_v33  ;;  %v465_v43 = vmul.f32 %v431_v33, %v431_v33  ;;  %v471_v44 = vadd.f32 %v470_v40, %v464_v39 }
  0xea   : > { %811 = dma.vmem_to_hbm [thread:$0]  (%p1179_p3), %s1241_s10, 512, %s1255_s19, %s475_s20, %s1071_s16, %s1071_s16, %s1072_s11  }
  0xeb   : > { %s1353_s0 = sshll.u32 %s1260_s25, 4  ;;  %v472_v45 = vadd.f32 %v471_v44, %v465_v43  ;;  %457 = vst [vmem:[%s1260_s25] sm:$0xff] %v456_v42  ;;  %s1354_s28 = sand.u32 1, %s1129_s23   ;;  %s515_s0 = int_to_ptr.vmem [resolvable:$true] %s1353_s0 }
  0xec   : > { %s480_s13 = scalar_lea.sflag [#allocation9], %s1354_s28  ;;  %s978_s7 = sshra.s32 %s517_s8, 4  ;;  %s979_s7 = int_to_ptr.hbm [resolvable:$true] %s978_s7 }
  0xed   : > { %s980_s24 = scalar_lea.hbm %s979_s7, 8  ;;  %s984_s20 = scalar_lea.hbm %s1343_s5, 16 }
  0xee   : > { %p981_p12 = scmp.ne.s32.totalorder %s979_s7, %s980_s24  ;;  %p985_p5 = scmp.lt.s32.totalorder %s979_s7, %s1343_s5 }
  0xef   : > { %p986_p7 = scmp.lt.s32.totalorder %s984_s20, %s980_s24 }
  0xf0   : > { %p982_p13 = pnand %p981_p12, %p1179_p3 }
  0xf1   : > { %p987_p1 = por %p986_p7, %p985_p5 }
  0xf2   : > { %p983_p0 = pneg %p982_p13 }
  0xf4   : > { %p988_p4 = pnand %p987_p1, %p983_p0 }
  0xf6   : > { %991 = shalt.err (!%p988_p4)
}
  0xf7   : > { %812 = dma.vmem_to_hbm [thread:$0]  (%p1179_p3), %s515_s0, 128, %s517_s8, %s480_s13   ;;  %473 = vst [vmem:[%s1268_s17] sm:$0xff] %v472_v45 }
  0xf8   : > { %s1006_s23 = sshra.s32 %s1290_s12, 4  ;;  %s1012_s11 = scalar_lea.hbm %s1344_s6, 16  ;;  %s1007_s23 = int_to_ptr.hbm [resolvable:$true] %s1006_s23 }
  0xf9   : > { %s1008_s25 = scalar_lea.hbm %s1007_s23, 8  ;;  %p1013_p2 = scmp.lt.s32.totalorder %s1007_s23, %s1344_s6 }
  0xfa   : > { %p1009_p8 = scmp.ne.s32.totalorder %s1007_s23, %s1008_s25  ;;  %p1014_p10 = scmp.lt.s32.totalorder %s1012_s11, %s1008_s25 }
  0xfc   : > { %p1010_p11 = pnand %p1009_p8, %p1179_p3  ;;  %p1015_p12 = por %p1014_p10, %p1013_p2 }
  0xfe   : > { %p1011_p9 = pneg %p1010_p11 }
 0x100   : > { %p1016_p13 = pnand %p1015_p12, %p1011_p9 }
 0x102   : > { %1019 = shalt.err (!%p1016_p13)
}
 0x103   : > { %813 = dma.vmem_to_hbm [thread:$0]  (%p1179_p3), %s1288_s18, 128, %s1290_s12, %s480_s13  }
 0x104 PF: > { %s542_s8 = sand.u32 1, %s1054_s2   ;;  %p1355_p0 = scmp.ge.s32.totalorder %s1066_s22, 2 }
 0x105   : > { %s543_s17 = scalar_lea.sflag [#allocation4], %s542_s8 }
 0x106   : > { %p826_p5 = pnand %p1355_p0, %p1145_p6 }
 0x108   : > { %p827_p7 = pneg %p826_p5 }
 0x10a   : > { %1045 = dma.done.wait (%p827_p7), %s543_s17, 512  }
 0x10b   : > { %1047 = vsyncadd (%p827_p7), %s543_s17, 4294966784  ;;  %s1356_s0 = sadd.s32 4294967294, %s1066_s22  }
 0x10c   : > { %s552_s24 = sand.u32 1, %s1356_s0  }
 0x10d   : > { %s553_s10 = scalar_lea.sflag [#allocation9], %s552_s24 }
 0x10e   : > { %1049 = dma.done.wait (%p827_p7), %s553_s10, 256  }
 0x10f   : > { %1051 = vsyncadd (%p827_p7), %s553_s10, 4294967040  ;;  %p24_p3 = scmp.ge.s32.totalorder %s1163_s9, 4   ;;  %s1357_s2 = smov %s1058_s21 }
 0x110   : > { %s1358_s21 = smov %s1062_s3  ;;  %s1359_s3 = smov %s1175_s14 }
 0x111   : > { %s1360_s22 = smov %s1163_s9  ;;  %26 = sbr.rel (!%p24_p3) target bundleno = 10 (0xa), region = 117 }
 0x116   :  { %569 = vsyncpa [#allocation3], 1 }
 0x117   :  { %571 = vsyncpa [#allocation3 + $0x1], 1 }
 0x118   :  { %572 = vsyncpa [#allocation6], 1 }
 0x119   :  { %573 = vsyncpa [#allocation4], 1 }
 0x11a   :  { %575 = vsyncpa [#allocation4 + $0x1], 1 }
 0x11b   :  { %576 = vsyncpa [#allocation9], 1 }
 0x11c   :  { %578 = vsyncpa [#allocation9 + $0x1], 1 }

</bundles_post_ra>
